<compile_context>
chip_gen: v6e
topology: v6e:2x2x1
jax: 0.10.0
libtpu: 0.0.40
codegen_flags: <defaults>
</compile_context>

<pallas_src>
import functools

import jax
import jax.numpy as jnp
from jax import lax
from jax.experimental import pallas as pl
from jax.experimental.pallas import tpu as pltpu


def _largest_aligned_divisor(total: int, cap: int, align: int):
    """Largest multiple of `align` that divides `total` and is <= cap, or None."""
    t = min(cap, total)
    t -= t % align
    while t >= align:
        if total % t == 0:
            return t
        t -= align
    return None


def _choose_tiles(B: int, C: int, HW: int, itemsize: int, max_block_bytes: int):
    """Pick (tb, tc, ts, grid_k) respecting the (8, 128) block constraints.

    Input block is (tb, tc, ts) on the (B, C, HW) view; output block is
    (tb, tc).  So: tb multiple of 8 or == B; tc multiple of 128 or == C;
    ts multiple of 128 or == HW.  ts need not divide HW (cdiv grid + mask).
    """
    # Batch tile.
    tb = B if B <= 8 else (_largest_aligned_divisor(B, 8, 8) or B)

    # Spatial (reduction / lane) tile; budget assumes the minimum channel tile.
    min_tc = C if C <= 128 else 128
    ts_budget = max(128, max_block_bytes // max(1, tb * min_tc * itemsize))
    if HW < 128 or HW <= ts_budget:
        ts = HW                                  # single step, no masking
    else:
        ts = max(128, min((HW // 128) * 128, (ts_budget // 128) * 128))
        d = _largest_aligned_divisor(HW, ts, 128)
        if d is not None and 2 * d >= ts:        # exact cover of comparable size
            ts = d
    grid_k = -(-HW // ts)                        # cdiv; masked tail iff HW % ts != 0

    # Channel tile: multiple of 128 (lane dim of the output) or the full C.
    if C <= 128:
        tc = C
    else:
        tc_budget = max(128, max_block_bytes // max(1, tb * ts * itemsize))
        tc = _largest_aligned_divisor(C, tc_budget, 128) or C

    # Megacore (v7x): make sure the "parallel" (B, C) grid has >= 2 blocks.
    if (B // tb) * (C // tc) < 2 and C % 128 == 0 and C >= 256:
        tc = _largest_aligned_divisor(C, C // 2, 128) or tc

    return tb, tc, ts, grid_k


def _gem_pool_kernel(p_ref, x_ref, o_ref, *, eps: float, hw: int, ts: int,
                     slab: int, compute_dtype):
    """Accumulate sum(clamp(x, eps)^p) over spatial tiles; finalize mean^(1/p).

    p_ref: SMEM (1,) f32        learned GeM exponent
    x_ref: VMEM (tb, tc, ts)    input tile, native NCHW layout (C on sublanes,
                                spatial positions on the 128-lane axis)
    o_ref: VMEM (tb, tc) f32    pooled output block; doubles as the f32
                                accumulator across the trailing spatial axis
    """
    k = pl.program_id(2)
    nk = pl.num_programs(2)

    @pl.when(k == 0)
    def _():
        o_ref[...] = jnp.zeros_like(o_ref)

    p32 = p_ref[0]                                 # f32 scalar (hoisted once)
    p_c = p32.astype(compute_dtype)
    masked = (hw % ts) != 0                        # static: tail tile is partial

    # Static slab loop over the lane (spatial) axis bounds live ranges of the
    # f32 intermediates when blocks are large.  Slices are static -> free views.
    for s0 in range(0, ts, slab):
        sw = min(slab, ts - s0)
        x = x_ref[:, :, s0:s0 + sw].astype(compute_dtype)   # (tb, tc, sw)
        xc = jnp.maximum(x, eps)                             # clamp(min=eps) > 0
        xp = jnp.exp(p_c * jnp.log(xc))                      # x^p on the EUP
        xp = xp.astype(jnp.float32)                          # accumulate in f32
        if masked:
            lane = lax.broadcasted_iota(jnp.int32, xp.shape, 2)
            xp = jnp.where(lane + (k * ts + s0) < hw, xp, 0.0)
        o_ref[...] += jnp.sum(xp, axis=-1)                   # lane reduce (XLU)

    @pl.when(k == nk - 1)
    def _():
        # mean^(1/p).  If the block underflowed to 0 (all-eps inputs with a
        # large p), log(0) = -inf and exp(-inf/p) = 0, matching PyTorch's pow
        # underflow behaviour.
        mean_p = o_ref[...] * (1.0 / float(hw))
        o_ref[...] = jnp.exp(jnp.log(mean_p) / p32)


def gem_forward(x: jax.Array, p: jax.Array, eps: float = 1e-6,
                normalize: bool = True,
                max_block_bytes: int = 8 * 1024 * 1024,
                compute_dtype=None) -> jax.Array:
    """GeM pooling + L2 normalize, matching the PyTorch module defaults.

    Args:
        x: (B, C, H, W) feature maps (NCHW, matching PyTorch).
        p: shape-(1,) learned exponent (nn.Parameter ones(1) * p).
        eps: clamp threshold.
        normalize: apply F.normalize(p=2, dim=1) on the pooled descriptor.
        max_block_bytes: per-input-block VMEM budget (double-buffered by the
            Pallas pipeline; 8 MiB keeps 2x blocks + temps well inside the
            32 MiB scoped VMEM limit on v5e/v6e/v7x).
        compute_dtype: dtype for the clamp/log/exp chain.  None = bf16 when
            the input is bf16 (v6e/v7x EUP), else f32.  Pass jnp.float32 to
            force the f32 path (recommended on v5e).

    Returns:
        (B, C) pooled (and L2-normalized) descriptors, dtype of x.
    """
    B, C, H, W = x.shape
    HW = H * W

    # Native NCHW view: (B, C, HW) — a free reshape, no extra HBM pass.
    x_flat = x.reshape(B, C, HW)

    if compute_dtype is None:
        compute_dtype = jnp.bfloat16 if x.dtype == jnp.bfloat16 else jnp.float32

    itemsize = jnp.dtype(x.dtype).itemsize
    tb, tc, ts, grid_k = _choose_tiles(B, C, HW, itemsize, max_block_bytes)
    grid = (B // tb, C // tc, grid_k)

    # Inner slab width (lane axis): ~256K elements per slab keeps intermediate
    # f32 temporaries around ~1 MiB each.
    if ts % 128 == 0:
        slab = max(128, ((256 * 1024) // max(1, tb * tc)) // 128 * 128)
        slab = min(slab, ts)
    else:
        slab = ts

    pooled = pl.pallas_call(
        functools.partial(_gem_pool_kernel, eps=eps, hw=HW, ts=ts, slab=slab,
                          compute_dtype=compute_dtype),
        out_shape=jax.ShapeDtypeStruct((B, C), jnp.float32),
        grid_spec=pltpu.PrefetchScalarGridSpec(
            num_scalar_prefetch=0,
            grid=grid,
            in_specs=[
                pl.BlockSpec(memory_space=pltpu.SMEM),                  # p
                pl.BlockSpec((tb, tc, ts), lambda b, c, k: (b, c, k)),  # x (NCHW)
            ],
            out_specs=pl.BlockSpec((tb, tc), lambda b, c, k: (b, c)),
        ),
        compiler_params=pltpu.CompilerParams(
            dimension_semantics=("parallel", "parallel", "arbitrary"),
            vmem_limit_bytes=32 * 1024 * 1024),
        cost_estimate=pl.CostEstimate(
            flops=4 * B * C * HW,
            transcendentals=2 * B * C * HW + 2 * B * C,
            bytes_accessed=B * C * HW * itemsize + B * C * 4 + 4),
    )(p.astype(jnp.float32).reshape(1), x_flat)

    if normalize:
        # F.normalize(..., p=2, dim=1): tiny (B, C) op needing the full C axis,
        # kept in the wrapper so the kernel can tile C freely.
        norm = jnp.maximum(
            jnp.sqrt(jnp.sum(pooled * pooled, axis=1, keepdims=True)), 1e-12)
        pooled = pooled / norm

    # TODO(synk): dense_head (Linear) and context_gating (GatingContext with
    # BatchNorm1d) are identity under the default constructor args and are not
    # instantiated here.
    return pooled.astype(x.dtype)


def gem_reference(x, p, eps=1e-6):
    """Pure-JAX reference mirroring the PyTorch forward (default args)."""
    pv = p.astype(jnp.float32)[0]
    xc = jnp.maximum(x.astype(jnp.float32), eps)
    pooled = jnp.mean(xc ** pv, axis=(2, 3)) ** (1.0 / pv)
    norm = jnp.maximum(jnp.linalg.norm(pooled, axis=1, keepdims=True), 1e-12)
    return (pooled / norm).astype(x.dtype)


if __name__ == "__main__":
    # Deterministic parameter init: p = ones(1) * 3  (as in the module __init__)
    p_param = jnp.ones((1,), dtype=jnp.float32) * 3.0

    # --- Test 1: small f32 NCHW feature maps (single block) ------------------
    B, C, H, W = 2, 4, 16, 16
    x = jax.random.uniform(jax.random.PRNGKey(0), (B, C, H, W),
                           dtype=jnp.float32, minval=0.0, maxval=2.0)
    out = gem_forward(x, p_param, eps=1e-6)
    jax.block_until_ready(out)
    ref = gem_reference(x, p_param, eps=1e-6)
    assert out.shape == (B, C), out.shape
    assert jnp.allclose(out, ref, atol=1e-5, rtol=1e-5)

    # --- Test 2: bf16 input, channel tiling + multi-step spatial reduction ---
    # (small max_block_bytes forces C and HW tiling; bf16 EUP math path)
    B2, C2, H2, W2 = 2, 512, 16, 16
    x2 = jax.random.uniform(jax.random.PRNGKey(1), (B2, C2, H2, W2),
                            dtype=jnp.float32, minval=0.0,
                            maxval=2.0).astype(jnp.bfloat16)
    out2 = gem_forward(x2, p_param, eps=1e-6, max_block_bytes=64 * 1024)
    jax.block_until_ready(out2)
    ref2 = gem_reference(x2, p_param, eps=1e-6)
    assert out2.shape == (B2, C2), out2.shape
    assert jnp.allclose(out2.astype(jnp.float32), ref2.astype(jnp.float32),
                        atol=2e-2, rtol=2e-2)

    # --- Test 3: non-multiple-of-128 spatial extent (masked tail tile) -------
    B3, C3, H3, W3 = 2, 128, 20, 20
    x3 = jax.random.uniform(jax.random.PRNGKey(2), (B3, C3, H3, W3),
                            dtype=jnp.float32, minval=0.0, maxval=2.0)
    out3 = gem_forward(x3, p_param, eps=1e-6, max_block_bytes=64 * 1024)
    jax.block_until_ready(out3)
    ref3 = gem_reference(x3, p_param, eps=1e-6)
    assert out3.shape == (B3, C3), out3.shape
    assert jnp.allclose(out3, ref3, atol=1e-5, rtol=1e-5)

    print("KERNEL_OK")
</pallas_src>

<mosaic_0001>
module attributes {stable_mosaic.version = 11 : i64} {
  func.func @_gem_pool_kernel(%arg0: i32, %arg1: i32, %arg2: i32, %arg3: memref<1xf32, #tpu.memory_space<smem>>, %arg4: memref<2x4x256xf32, #tpu.memory_space<vmem>>, %arg5: memref<2x4xf32, #tpu.memory_space<vmem>>) attributes {dimension_semantics = [#tpu.dimension_semantics<parallel>, #tpu.dimension_semantics<parallel>, #tpu.dimension_semantics<arbitrary>], iteration_bounds = array<i64: 1, 1, 1>, scalar_prefetch = 0 : i64, scratch_operands = 0 : i64, tpu.core_type = #tpu.core_type<tc>, window_params = [{transform_indices = @transform_0, window_bounds = array<i64: 1>}, {transform_indices = @transform_1, window_bounds = array<i64: 2, 4, 256>}, {transform_indices = @transform_2, window_bounds = array<i64: 2, 4>}]} {
    %c0_i32 = arith.constant 0 : i32
    %0 = arith.cmpi eq, %arg2, %c0_i32 : i32
    %1 = arith.extui %0 : i1 to i32
    %c0_i32_0 = arith.constant 0 : i32
    %2 = arith.cmpi ne, %1, %c0_i32_0 : i32
    scf.if %2 {
      %cst_11 = arith.constant 0.000000e+00 : f32
      %18 = vector.broadcast %cst_11 : f32 to vector<2x4xf32>
      %c0_12 = arith.constant 0 : index
      %c0_13 = arith.constant 0 : index
      %19 = vector.load %arg5[%c0_12, %c0_13] : memref<2x4xf32, #tpu.memory_space<vmem>>, vector<2x4xf32>
      tpu.vector_store %arg5[%c0_12, %c0_13], %18 {strides = array<i32>} : memref<2x4xf32, #tpu.memory_space<vmem>>, vector<2x4xf32>,
    } else {
    }
    %c0 = arith.constant 0 : index
    %3 = memref.load %arg3[%c0] : memref<1xf32, #tpu.memory_space<smem>>
    %c0_1 = arith.constant 0 : index
    %c0_2 = arith.constant 0 : index
    %c0_3 = arith.constant 0 : index
    %4 = vector.load %arg4[%c0_1, %c0_2, %c0_3] : memref<2x4x256xf32, #tpu.memory_space<vmem>>, vector<2x4x256xf32>
    %cst = arith.constant 9.99999997E-7 : f32
    %5 = vector.broadcast %cst : f32 to vector<2x4x256xf32>
    %6 = arith.maximumf %4, %5 : vector<2x4x256xf32>
    %7 = math.log %6 : vector<2x4x256xf32>
    %8 = vector.broadcast %3 : f32 to vector<2x4x256xf32>
    %9 = arith.mulf %8, %7 : vector<2x4x256xf32>
    %10 = math.exp %9 : vector<2x4x256xf32>
    %c0_4 = arith.constant 0 : index
    %c0_5 = arith.constant 0 : index
    %11 = vector.load %arg5[%c0_4, %c0_5] : memref<2x4xf32, #tpu.memory_space<vmem>>, vector<2x4xf32>
    %cst_6 = arith.constant dense<0.000000e+00> : vector<2x4xf32>
    %12 = vector.multi_reduction <add>, %10, %cst_6 [2] : vector<2x4x256xf32> to vector<2x4xf32>
    %13 = arith.addf %11, %12 : vector<2x4xf32>
    %c0_7 = arith.constant 0 : index
    %c0_8 = arith.constant 0 : index
    %14 = vector.load %arg5[%c0_7, %c0_8] : memref<2x4xf32, #tpu.memory_space<vmem>>, vector<2x4xf32>
    tpu.vector_store %arg5[%c0_7, %c0_8], %13 {strides = array<i32>} : memref<2x4xf32, #tpu.memory_space<vmem>>, vector<2x4xf32>,
    %c0_i32_9 = arith.constant 0 : i32
    %15 = arith.cmpi eq, %arg2, %c0_i32_9 : i32
    %16 = arith.extui %15 : i1 to i32
    %c0_i32_10 = arith.constant 0 : i32
    %17 = arith.cmpi ne, %16, %c0_i32_10 : i32
    scf.if %17 {
      %c0_11 = arith.constant 0 : index
      %c0_12 = arith.constant 0 : index
      %18 = vector.load %arg5[%c0_11, %c0_12] : memref<2x4xf32, #tpu.memory_space<vmem>>, vector<2x4xf32>
      %cst_13 = arith.constant 3.906250e-03 : f32
      %19 = vector.broadcast %cst_13 : f32 to vector<2x4xf32>
      %20 = arith.mulf %18, %19 : vector<2x4xf32>
      %21 = math.log %20 : vector<2x4xf32>
      %22 = vector.broadcast %3 : f32 to vector<2x4xf32>
      %23 = arith.divf %21, %22 : vector<2x4xf32>
      %24 = math.exp %23 : vector<2x4xf32>
      %c0_14 = arith.constant 0 : index
      %c0_15 = arith.constant 0 : index
      %25 = vector.load %arg5[%c0_14, %c0_15] : memref<2x4xf32, #tpu.memory_space<vmem>>, vector<2x4xf32>
      tpu.vector_store %arg5[%c0_14, %c0_15], %24 {strides = array<i32>} : memref<2x4xf32, #tpu.memory_space<vmem>>, vector<2x4xf32>,
    } else {
    }
    return
  }
  func.func @transform_0(%arg0: i32, %arg1: i32, %arg2: i32) -> i32 {
    %c0_i32 = arith.constant 0 : i32
    %c0_i32_0 = arith.constant 0 : i32
    return %c0_i32 : i32
  }
  func.func @transform_1(%arg0: i32, %arg1: i32, %arg2: i32) -> (i32, i32, i32) {
    %c0_i32 = arith.constant 0 : i32
    return %arg0, %arg1, %arg2 : i32, i32, i32
  }
  func.func @transform_2(%arg0: i32, %arg1: i32, %arg2: i32) -> (i32, i32) {
    %c0_i32 = arith.constant 0 : i32
    return %arg0, %arg1 : i32, i32
  }
}

</mosaic_0001>

<bundles_post_ra>
// kernel: tpu_custom_call.1
= control target key start
LH: loop header
LB: loop body
LE: loop exit
PB: predicated region body
PF: predicated region fallthrough
CT: control target
= control target key end

     0   :  { %8 = vsyncpa [#allocation4], 0  ;;  %s207_s0 = inlined_call_operand.<no memory space> [shape: f32[1], index: 0, kind: input, shape index: {}]   ;;  %s208_s1 = inlined_call_operand.hbm [shape: f32[2,4,256], index: 1, kind: input, shape index: {}]   ;;  %s209_s2 = inlined_call_operand.hbm [shape: f32[2,4], index: 2, kind: output, shape index: {}]  }
   0x1   :  { %9 = vsyncpa [#allocation5], 0  ;;  %s175_s9 = smov [#allocation3]  }
   0x2   :  { %s17_s10 = sshll.u32 %s175_s9, 4  ;;  %s18_s10 = int_to_ptr.vmem [resolvable:$true] %s17_s10 }
   0x3   :  { %s139_s11 = scalar_lea.vmem %s18_s10, 256  ;;  %p144_p1 = scmp.lt.s32.totalorder %s18_s10, %s18_s10 }
   0x4   :  { %p140_p0 = scmp.ne.s32.totalorder %s18_s10, %s139_s11  ;;  %p145_p2 = scmp.lt.s32.totalorder %s139_s11, %s139_s11 }
   0x6   :  { %p146_p3 = por %p145_p2, %p144_p1 }
   0x8   :  { %p147_p4 = pnand %p146_p3, %p140_p0 }
   0xa   :  { %150 = shalt.err (!%p147_p4)
}
   0xb   :  { %s176_s12 = smov 128   ;;  %s177_s13 = smov 8  }
   0xc   :  { %23 = dma.hbm_to_vmem [thread:$0]  %s208_s1, 256, %s18_s10, [#allocation4], %s176_s12, %s176_s12, %s177_s13  }
   0xd   :  { %171 = dma.done.wait [#allocation4], 256  }
   0xe   :  { %172 = vsyncadd [#allocation4], 4294967040  ;;  %v34_v0 = vld [vmem:[#allocation3] sm:$0xff]  ;;  %v35_v1 = vld [vmem:[#allocation3 + $0x8] sm:$0xff]  ;;  %v42_v5 = vstv %s207_s0  ;;  %vm56_vm0 = vcmask 1043456   ;;  %vm31_vm1 = vcmask 25600   ;;  %v69_v24 = vlaneseq }
   0xf   :  { %v36_v2 = vmax.f32 %v34_v0, 1e-06  ;;  %v37_v3 = vmax.f32 %v35_v1, 1e-06  ;;  %v178_v23 = vmov 0.0   ;;  %vm79_vm2 = vcmask 1041409  }
  0x10   :  { %32 = vst.msk [vmem:[#allocation6] sm:$0x3] %vm31_vm1, %v178_v23  ;;  %v70_v25 = vand.u32 127, %v69_v24  ;;  %v72_v26 = vshrl.u32 %v69_v24, 7  ;;  %s179_s0 = smov [#allocation6]  }
  0x11   :  { %117 = vlog2.f32 %v36_v2  ;;  %s103_s1 = sshll.u32 %s179_s0, 4  ;;  %s104_s1 = int_to_ptr.vmem [resolvable:$true] %s103_s1 }
  0x12   :  { %119 = vlog2.f32 %v37_v3  ;;  %v73_v28 = vsub.s32 %v70_v25, %v72_v26  ;;  %s151_s18 = scalar_lea.vmem %s104_s1, 32  ;;  %p156_p6 = scmp.lt.s32.totalorder %s104_s1, %s104_s1 }
  0x13   :  { %p152_p5 = scmp.ne.s32.totalorder %s104_s1, %s151_s18  ;;  %p157_p7 = scmp.lt.s32.totalorder %s151_s18, %s151_s18 }
  0x15   :  { %p158_p8 = por %p157_p7, %p156_p6 }
  0x17   :  { %v49_v31 = vld [vmem:[#allocation6] sm:$0x3]  ;;  %p159_p9 = pnand %p158_p8, %p152_p5 }
  0x1e   :  { %v118_v4 = vpop.eup %117 }
  0x1f   :  { %v120_v6 = vpop.eup %119  ;;  %v39_v7 = vmul.f32 0.6931472, %v118_v4 }
  0x20   :  { %v41_v8 = vmul.f32 0.6931472, %v120_v6 }
  0x21   :  { %v43_v9 = vmul.f32 %v42_v5, %v39_v7 }
  0x22   :  { %v44_v10 = vmul.f32 %v42_v5, %v41_v8 }
  0x23   :  { %v45_v11 = vmul.f32 1.442695, %v43_v9 }
  0x24   :  { %v47_v12 = vmul.f32 1.442695, %v44_v10 }
  0x25   :  { %121 = vpow2.f32 %v45_v11 }
  0x26   :  { %123 = vpow2.f32 %v47_v12 }
  0x27   :  { %125 = vrcp.f32 %v42_v5 }
  0x32   :  { %v122_v13 = vpop.eup %121 }
  0x33   :  { %v124_v14 = vpop.eup %123  ;;  %v52_v15 = vcombine.high %v122_v13, %v122_v13  ;;  %v57_v16 = vsel %vm56_vm0, %v122_v13, 0.0 }
  0x34   :  { %v53_v17 = vcombine.high %v124_v14, %v124_v14  ;;  %v62_v19 = vsel %vm56_vm0, %v124_v14, 0.0  ;;  %v126_v37 = vpop.eup %125 }
  0x35   :  { %v58_v18 = vsel %vm56_vm0, %v52_v15, 0.0 }
  0x36   :  { %v59_v20 = vadd.f32 %v58_v18, %v57_v16  ;;  %v63_v21 = vsel %vm56_vm0, %v53_v17, 0.0 }
  0x37   :  { %v64_v22 = vadd.f32 %v63_v21, %v62_v19 }
  0x38   :  { %60 = vadd.xlane.f32.xlu0 %v59_v20 }
  0x3c   :  { %65 = vadd.xlane.f32.xlu0 %v64_v22 }
  0xc1   :  { %v61_v27 = vpop.xlane.xlu0 %60 }
  0xc2   :  { %v74_v30 = vrot.slane %v61_v27, %v73_v28 }
  0xc5   :  { %v66_v29 = vpop.xlane.xlu0 %65 }
  0xc6   :  { %v78_v32 = vrot.slane %v66_v29, %v73_v28 }
  0xc8   :  { %v80_v33 = vsel %vm79_vm2, %v78_v32, %v74_v30 }
  0xc9   :  { %v82_v34 = vadd.f32 %v80_v33, %v49_v31 }
  0xcb   :  { %84 = vst.msk [vmem:[#allocation6] sm:$0x3] %vm31_vm1, %v82_v34 }
  0xd2   :  { %v88_v35 = vld [vmem:[#allocation6] sm:$0x3] }
  0xd3   :  { %v89_v36 = vmul.f32 0.00390625, %v88_v35 }
  0xd5   :  { %127 = vlog2.f32 %v89_v36 }
  0xe2   :  { %v128_v38 = vpop.eup %127 }
  0xe3   :  { %v91_v39 = vmul.f32 0.6931472, %v128_v38 }
  0xe5   :  { %v93_v40 = vmul.f32 %v126_v37, %v91_v39 }
  0xe7   :  { %v94_v41 = vmul.f32 1.442695, %v93_v40 }
  0xe9   :  { %129 = vpow2.f32 %v94_v41 }
  0xf6   :  { %v130_v42 = vpop.eup %129 }
  0xf7   :  { %96 = vst.msk [vmem:[#allocation6] sm:$0x3] %vm31_vm1, %v130_v42 }
  0xf8   :  { %162 = shalt.err (!%p159_p9)
}
  0xf9   :  { %106 = dma.vmem_to_hbm [thread:$0]  %s104_s1, 32, %s209_s2, [#allocation5]  }
  0xfa   :  { %173 = dma.done.wait [#allocation5], 32  }
  0xfb   :  { %174 = vsyncadd [#allocation5], 4294967264 }
  0xfc   :  { %110 = vsyncpa [#allocation4], 1 }
  0xfd   :  { %111 = vsyncpa [#allocation5], 1 }

</bundles_post_ra>
